<compile_context>
chip_gen: v7x
topology: tpu7x:2x2x1
jax: 0.10.0
libtpu: 0.0.40
codegen_flags: <defaults>
</compile_context>

<pallas_src>
import jax
import jax.numpy as jnp
from jax.experimental import pallas as pl
from jax.experimental.pallas import tpu as pltpu


def _model_kernel(x_ref, ws_ref, wh_ref, o_ref):
    # x_ref : (BN, C, HW)   batch tile; pixels (HW) stay on the lane axis
    # ws_ref: (F, C + 1)    1x1-conv stem: columns 0..C-1 = wc^T, column C = conv bias
    # wh_ref: (F + 1, K)    fc head: rows 0..F-1 = wf, row F = fc bias
    # o_ref : (BN, K)       sigmoid predictions for this batch tile
    bn, c, hw = x_ref.shape
    f = ws_ref.shape[0]

    x = x_ref[...]                                           # (BN, C, HW)

    # 1x1-conv stem on the VPU: C unrolled broadcast-FMAs.  Contraction depth C
    # is far too shallow for the MXU, so keep it off the vmatmul path entirely.
    # The accumulator starts at the (folded-in) conv bias.
    acc = ws_ref[:, c:c + 1].reshape(1, f, 1)                # (1, F, 1) bias
    for ci in range(c):                                      # static unroll over C
        w_col = ws_ref[:, ci:ci + 1].reshape(1, f, 1)        # (1, F, 1)
        acc = acc + w_col * x[:, ci:ci + 1, :]               # -> (BN, F, HW)
    feat = jnp.maximum(acc, 0.0)                             # ReLU (pre-pool)

    # Global average pool = lane-axis mean (XLU reduction); pooled lands
    # directly in (BN, F) layout for the canonical fc matmul.
    pooled = jnp.mean(feat, axis=2)                          # (BN, F)

    # fc head: Linear(F, K) with the bias folded in as the last row of wh.
    logits = jnp.dot(pooled, wh_ref[:f, :],
                     preferred_element_type=jnp.float32) + wh_ref[f:, :]   # (BN, K)

    # Sigmoid + single store of this batch tile's predictions.
    o_ref[...] = jax.nn.sigmoid(logits).astype(o_ref.dtype)


def pack_params(wc, bc, wf, bf):
    """Fold biases into the weight operands (done once, outside the forward)."""
    f = wc.shape[1]
    k = wf.shape[1]
    w_stem = jnp.concatenate([wc.T, bc.reshape(f, 1)], axis=1).astype(jnp.float32)  # (F, C+1)
    w_head = jnp.concatenate([wf, bf.reshape(1, k)], axis=0).astype(jnp.float32)    # (F+1, K)
    return w_stem, w_head


@jax.jit
def my_model_forward(x_nchw, w_stem, w_head):
    """x_nchw: [N, C, H, W] float32 -> predictions [N, num_classes]."""
    N, C, H, W = x_nchw.shape
    HW = H * W
    F = w_stem.shape[0]
    K = w_head.shape[1]

    # Pure view: NCHW -> (N, C, HW). No transpose pass over HBM.
    x = x_nchw.reshape(N, C, HW)

    # Batch tile: whole batch when tiny, otherwise blocks of 8 samples.  The
    # per-tile working set (x tile + feat tile, double-buffered) stays far under
    # the explicit 32 MiB VMEM limit below (safe on v7x's 64 MiB physical VMEM).
    BN = N if N <= 8 else 8
    assert N % BN == 0, "demo path assumes the batch tiles evenly"
    grid = (N // BN,)

    return pl.pallas_call(
        _model_kernel,
        out_shape=jax.ShapeDtypeStruct((N, K), jnp.float32),
        grid_spec=pltpu.PrefetchScalarGridSpec(
            num_scalar_prefetch=0,
            grid=grid,
            in_specs=[
                pl.BlockSpec((BN, C, HW), lambda i: (i, 0, 0)),
                pl.BlockSpec((F, C + 1), lambda i: (0, 0)),
                pl.BlockSpec((F + 1, K), lambda i: (0, 0)),
            ],
            out_specs=pl.BlockSpec((BN, K), lambda i: (i, 0)),
        ),
        compiler_params=pltpu.CompilerParams(
            dimension_semantics=("parallel",),       # shards batch tiles across TCs on v7x
            vmem_limit_bytes=32 * 1024 * 1024,
        ),
    )(x, w_stem, w_head)


def reference_forward(x_nchw, wc, bc, wf, bf):
    N, C, H, W = x_nchw.shape
    x = jnp.transpose(x_nchw, (0, 2, 3, 1)).reshape(N, H * W, C)
    feat = jnp.maximum(jnp.einsum("npc,cf->npf", x, wc) + bc, 0.0)
    pooled = jnp.mean(feat, axis=1)
    logits = pooled @ wf + bf
    return jax.nn.sigmoid(logits)


if __name__ == "__main__":
    # Small shapes consistent with the module's forward:
    #   batch=2, channels=4, spatial=16x16, bottleneck_size=32, num_classes=8
    N, C, H, W = 2, 4, 16, 16
    bottleneck_size = 32
    num_classes = 8

    key = jax.random.PRNGKey(0)
    kx, kwc, kbc, kwf, kbf = jax.random.split(key, 5)

    x = jax.random.normal(kx, (N, C, H, W), dtype=jnp.float32)

    # Deterministic parameter init (synthetic weights, no checkpoint load).
    wc = jax.random.normal(kwc, (C, bottleneck_size), dtype=jnp.float32) * 0.1
    bc = jax.random.normal(kbc, (bottleneck_size,), dtype=jnp.float32) * 0.01
    wf = jax.random.normal(kwf, (bottleneck_size, num_classes), dtype=jnp.float32) * 0.1
    bf = jax.random.normal(kbf, (num_classes,), dtype=jnp.float32) * 0.01

    # Pack biases into the weight operands once (parameter preparation).
    w_stem, w_head = pack_params(wc, bc, wf, bf)

    pred = my_model_forward(x, w_stem, w_head)
    pred = jax.block_until_ready(pred)

    ref = reference_forward(x, wc, bc, wf, bf)
    assert pred.shape == (N, num_classes), pred.shape
    assert jnp.allclose(pred, ref, atol=1e-5, rtol=1e-5), (
        f"max diff {jnp.max(jnp.abs(pred - ref))}"
    )

    print("KERNEL_OK")
</pallas_src>

<mosaic_0001>
module attributes {stable_mosaic.version = 11 : i64} {
  func.func @_model_kernel(%arg0: i32, %arg1: memref<2x4x256xf32, #tpu.memory_space<vmem>>, %arg2: memref<32x5xf32, #tpu.memory_space<vmem>>, %arg3: memref<33x8xf32, #tpu.memory_space<vmem>>, %arg4: memref<2x8xf32, #tpu.memory_space<vmem>>) attributes {dimension_semantics = [#tpu.dimension_semantics<parallel>], iteration_bounds = array<i64: 1>, scalar_prefetch = 0 : i64, scratch_operands = 0 : i64, tpu.core_type = #tpu.core_type<tc>, window_params = [{transform_indices = @transform_0, window_bounds = array<i64: 2, 4, 256>}, {pipeline_mode = #tpu.pipeline_mode<synchronous>, transform_indices = @transform_1, window_bounds = array<i64: 32, 5>}, {pipeline_mode = #tpu.pipeline_mode<synchronous>, transform_indices = @transform_2, window_bounds = array<i64: 33, 8>}, {transform_indices = @transform_3, window_bounds = array<i64: 2, 8>}]} {
    %c0 = arith.constant 0 : index
    %c0_0 = arith.constant 0 : index
    %c0_1 = arith.constant 0 : index
    %0 = vector.load %arg1[%c0, %c0_0, %c0_1] : memref<2x4x256xf32, #tpu.memory_space<vmem>>, vector<2x4x256xf32>
    %c0_2 = arith.constant 0 : index
    %c4 = arith.constant 4 : index
    %1 = vector.load %arg2[%c0_2, %c4] : memref<32x5xf32, #tpu.memory_space<vmem>>, vector<32x1xf32>
    %2 = vector.shape_cast %1 : vector<32x1xf32> to vector<1x32x1xf32>
    %c0_3 = arith.constant 0 : index
    %c0_4 = arith.constant 0 : index
    %3 = vector.load %arg2[%c0_3, %c0_4] : memref<32x5xf32, #tpu.memory_space<vmem>>, vector<32x1xf32>
    %4 = vector.shape_cast %3 : vector<32x1xf32> to vector<1x32x1xf32>
    %5 = vector.extract_strided_slice %0 {offsets = [0, 0, 0], sizes = [2, 1, 256], strides = [1, 1, 1]} : vector<2x4x256xf32> to vector<2x1x256xf32>
    %6 = vector.broadcast %4 : vector<1x32x1xf32> to vector<2x32x256xf32>
    %7 = vector.broadcast %5 : vector<2x1x256xf32> to vector<2x32x256xf32>
    %8 = arith.mulf %6, %7 : vector<2x32x256xf32>
    %9 = vector.broadcast %2 : vector<1x32x1xf32> to vector<2x32x256xf32>
    %10 = arith.addf %9, %8 : vector<2x32x256xf32>
    %c0_5 = arith.constant 0 : index
    %c1 = arith.constant 1 : index
    %11 = vector.load %arg2[%c0_5, %c1] : memref<32x5xf32, #tpu.memory_space<vmem>>, vector<32x1xf32>
    %12 = vector.shape_cast %11 : vector<32x1xf32> to vector<1x32x1xf32>
    %13 = vector.extract_strided_slice %0 {offsets = [0, 1, 0], sizes = [2, 1, 256], strides = [1, 1, 1]} : vector<2x4x256xf32> to vector<2x1x256xf32>
    %14 = vector.broadcast %12 : vector<1x32x1xf32> to vector<2x32x256xf32>
    %15 = vector.broadcast %13 : vector<2x1x256xf32> to vector<2x32x256xf32>
    %16 = arith.mulf %14, %15 : vector<2x32x256xf32>
    %17 = arith.addf %10, %16 : vector<2x32x256xf32>
    %c0_6 = arith.constant 0 : index
    %c2 = arith.constant 2 : index
    %18 = vector.load %arg2[%c0_6, %c2] : memref<32x5xf32, #tpu.memory_space<vmem>>, vector<32x1xf32>
    %19 = vector.shape_cast %18 : vector<32x1xf32> to vector<1x32x1xf32>
    %20 = vector.extract_strided_slice %0 {offsets = [0, 2, 0], sizes = [2, 1, 256], strides = [1, 1, 1]} : vector<2x4x256xf32> to vector<2x1x256xf32>
    %21 = vector.broadcast %19 : vector<1x32x1xf32> to vector<2x32x256xf32>
    %22 = vector.broadcast %20 : vector<2x1x256xf32> to vector<2x32x256xf32>
    %23 = arith.mulf %21, %22 : vector<2x32x256xf32>
    %24 = arith.addf %17, %23 : vector<2x32x256xf32>
    %c0_7 = arith.constant 0 : index
    %c3 = arith.constant 3 : index
    %25 = vector.load %arg2[%c0_7, %c3] : memref<32x5xf32, #tpu.memory_space<vmem>>, vector<32x1xf32>
    %26 = vector.shape_cast %25 : vector<32x1xf32> to vector<1x32x1xf32>
    %27 = vector.extract_strided_slice %0 {offsets = [0, 3, 0], sizes = [2, 1, 256], strides = [1, 1, 1]} : vector<2x4x256xf32> to vector<2x1x256xf32>
    %28 = vector.broadcast %26 : vector<1x32x1xf32> to vector<2x32x256xf32>
    %29 = vector.broadcast %27 : vector<2x1x256xf32> to vector<2x32x256xf32>
    %30 = arith.mulf %28, %29 : vector<2x32x256xf32>
    %31 = arith.addf %24, %30 : vector<2x32x256xf32>
    %cst = arith.constant 0.000000e+00 : f32
    %32 = vector.broadcast %cst : f32 to vector<2x32x256xf32>
    %33 = arith.maximumf %31, %32 : vector<2x32x256xf32>
    %cst_8 = arith.constant dense<0.000000e+00> : vector<2x32xf32>
    %34 = vector.multi_reduction <add>, %33, %cst_8 [2] : vector<2x32x256xf32> to vector<2x32xf32>
    %cst_9 = arith.constant 2.560000e+02 : f32
    %35 = vector.broadcast %cst_9 : f32 to vector<2x32xf32>
    %36 = arith.divf %34, %35 : vector<2x32xf32>
    %c0_10 = arith.constant 0 : index
    %c0_11 = arith.constant 0 : index
    %37 = vector.load %arg3[%c0_10, %c0_11] : memref<33x8xf32, #tpu.memory_space<vmem>>, vector<32x8xf32>
    %cst_12 = arith.constant dense<0.000000e+00> : vector<2x8xf32>
    %38 = tpu.matmul %36, %37, %cst_12 {dimension_numbers = #tpu.dot_dimension_numbers<[1], [0], [0], [1], [0, 0, 1, 1], [], []>} : vector<2x32xf32>, vector<32x8xf32>, vector<2x8xf32> -> vector<2x8xf32>
    %c32 = arith.constant 32 : index
    %c0_13 = arith.constant 0 : index
    %39 = vector.load %arg3[%c32, %c0_13] : memref<33x8xf32, #tpu.memory_space<vmem>>, vector<1x8xf32>
    %40 = vector.broadcast %39 : vector<1x8xf32> to vector<2x8xf32>
    %41 = arith.addf %38, %40 : vector<2x8xf32>
    %42 = arith.negf %41 : vector<2x8xf32>
    %43 = math.exp %42 : vector<2x8xf32>
    %cst_14 = arith.constant 1.000000e+00 : f32
    %44 = vector.broadcast %cst_14 : f32 to vector<2x8xf32>
    %45 = arith.addf %44, %43 : vector<2x8xf32>
    %46 = arith.divf %44, %45 : vector<2x8xf32>
    %c0_15 = arith.constant 0 : index
    %c0_16 = arith.constant 0 : index
    %47 = vector.load %arg4[%c0_15, %c0_16] : memref<2x8xf32, #tpu.memory_space<vmem>>, vector<2x8xf32>
    tpu.vector_store %arg4[%c0_15, %c0_16], %46 {strides = array<i32>} : memref<2x8xf32, #tpu.memory_space<vmem>>, vector<2x8xf32>,
    return
  }
  func.func @transform_0(%arg0: i32) -> (i32, i32, i32) {
    %c0_i32 = arith.constant 0 : i32
    %c0_i32_0 = arith.constant 0 : i32
    %c0_i32_1 = arith.constant 0 : i32
    return %arg0, %c0_i32, %c0_i32_0 : i32, i32, i32
  }
  func.func @transform_1(%arg0: i32) -> (i32, i32) {
    %c0_i32 = arith.constant 0 : i32
    %c0_i32_0 = arith.constant 0 : i32
    %c0_i32_1 = arith.constant 0 : i32
    return %c0_i32, %c0_i32_0 : i32, i32
  }
  func.func @transform_2(%arg0: i32) -> (i32, i32) {
    %c0_i32 = arith.constant 0 : i32
    %c0_i32_0 = arith.constant 0 : i32
    %c0_i32_1 = arith.constant 0 : i32
    return %c0_i32, %c0_i32_0 : i32, i32
  }
  func.func @transform_3(%arg0: i32) -> (i32, i32) {
    %c0_i32 = arith.constant 0 : i32
    %c0_i32_0 = arith.constant 0 : i32
    return %arg0, %c0_i32 : i32, i32
  }
}

</mosaic_0001>

<bundles_post_ra>
// kernel: my_model_forward.1
= control target key start
LH: loop header
LB: loop body
LE: loop exit
PB: predicated region body
PF: predicated region fallthrough
CT: control target
= control target key end

     0   :  { %v662_v2 = vmov 0   ;;  %s836_s0 = inlined_call_operand.vmem [shape: f32[2,4,256], index: 0, kind: input, shape index: {}]   ;;  %s837_s1 = inlined_call_operand.vmem [shape: f32[32,5], index: 1, kind: input, shape index: {}]   ;;  %s838_s2 = inlined_call_operand.vmem [shape: f32[33,8], index: 2, kind: input, shape index: {}]   ;;  %s839_s3 = inlined_call_operand.hbm [shape: f32[2,8], index: 3, kind: output, shape index: {}]  }
   0x1   :  { %v19_v0 = vld [vmem:[%s837_s1 + $0x10] sm:$0xff]  ;;  %v17_v1 = vld [vmem:[%s837_s1] sm:$0xff]  ;;  %623 = vset.pattern.permute.xlu1 %v662_v2  ;;  %622 = vset.pattern.permute.xlu0 %v662_v2 }
   0x2   :  { %33 = vperm.xlu1 %623, %v19_v0   ;;  %23 = vperm.xlu0 %622, %v17_v1  }
   0x3   :  { %8 = vsyncpa [#allocation3], 0  ;;  %v20_v3 = vld [vmem:[%s837_s1 + $0x18] sm:$0xff]  ;;  %v18_v4 = vld [vmem:[%s837_s1 + $0x8] sm:$0xff]  ;;  %v663_v5 = vmov 4   ;;  %v664_v6 = vmov 1   ;;  %v43_v9 = vlaneseq }
   0x4   :  { %v665_v7 = vmov 2   ;;  %v666_v8 = vmov 3   ;;  %v15_v17 = vld [vmem:[%s836_s0] sm:$0xff]  ;;  %v16_v18 = vld [vmem:[%s836_s0 + $0x8] sm:$0xff]  ;;  %vm668_vm0 = vmmov 0   ;;  %vm456_vm1 = vcmask 130112  }
   0x5   :  { %v706_v12 = vshrl.u32 %v43_v9, 7  ;;  %vm463_vm2 = vcmask 195712   ;;  %vm470_vm3 = vcmask 261312   ;;  %vm491_vm4 = vcmask 1041409   ;;  %s670_s5 = smov [#allocation2]  }
   0x6   :  { %38 = vperm.xlu1 %623, %v20_v3   ;;  %28 = vperm.xlu0 %622, %v18_v4   ;;  %vm493_vm5 = vcmask 261120   ;;  %s580_s6 = sshll.u32 %s670_s5, 4  ;;  %vm572_vm6 = vcmask 58368   ;;  %s581_s6 = int_to_ptr.vmem [resolvable:$true] %s580_s6 }
   0x7   :  { %v45_v15 = vsub.s32 0, %v706_v12  ;;  %v49_v16 = vsub.s32 4, %v706_v12  ;;  %v145_v20 = vsub.s32 1, %v706_v12  ;;  %v149_v21 = vsub.s32 5, %v706_v12  ;;  %s638_s7 = scalar_lea.vmem %s581_s6, 32  ;;  %p643_p1 = scmp.lt.s32.totalorder %s581_s6, %s581_s6 }
   0x8   :  { %v229_v23 = vsub.s32 2, %v706_v12  ;;  %v233_v28 = vsub.s32 6, %v706_v12  ;;  %v313_v29 = vsub.s32 3, %v706_v12  ;;  %v317_v31 = vsub.s32 7, %v706_v12  ;;  %p639_p0 = scmp.ne.s32.totalorder %s581_s6, %s638_s7  ;;  %p644_p2 = scmp.lt.s32.totalorder %s638_s7, %s638_s7 }
   0x9   :  { %v46_v24 = vrot.slane %v15_v17, %v45_v15  ;;  %v50_v25 = vrot.slane %v15_v17, %v49_v16  ;;  %v54_v26 = vrot.slane %v16_v18, %v45_v15  ;;  %v58_v27 = vrot.slane %v16_v18, %v49_v16 }
   0xa   :  { %624 = vset.pattern.permute.xlu1 %v663_v5  ;;  %626 = vset.pattern.permute.xlu0 %v664_v6  ;;  %v146_v30 = vrot.slane %v15_v17, %v145_v20  ;;  %v150_v32 = vrot.slane %v15_v17, %v149_v21  ;;  %v154_v33 = vrot.slane %v16_v18, %v145_v20  ;;  %p645_p3 = por %p644_p2, %p643_p1 }
   0xb   :  { %100 = vperm.xlu1 %624, %v18_v4   ;;  %132 = vperm.xlu0 %626, %v18_v4   ;;  %v158_v34 = vrot.slane %v16_v18, %v149_v21  ;;  %v230_v36 = vrot.slane %v15_v17, %v229_v23  ;;  %v66_v37 = vrot.slane %v46_v24, %v45_v15 }
   0xc   :  { %v70_v38 = vrot.slane %v50_v25, %v45_v15  ;;  %v74_v39 = vrot.slane %v54_v26, %v45_v15  ;;  %v78_v40 = vrot.slane %v58_v27, %v45_v15  ;;  %v234_v42 = vrot.slane %v15_v17, %v233_v28  ;;  %p646_p4 = pnand %p645_p3, %p639_p0 }
   0xd   :  { %v238_v43 = vrot.slane %v16_v18, %v229_v23  ;;  %v242_v44 = vrot.slane %v16_v18, %v233_v28  ;;  %v314_v45 = vrot.slane %v15_v17, %v313_v29  ;;  %v724_v46 = vrot.slane %v146_v30, %v145_v20 }
   0xe   :  { %v318_v47 = vrot.slane %v15_v17, %v317_v31  ;;  %v322_v48 = vrot.slane %v16_v18, %v313_v29  ;;  %v326_v49 = vrot.slane %v16_v18, %v317_v31  ;;  %v726_v50 = vrot.slane %v150_v32, %v145_v20 }
   0xf   :  { %625 = vset.pattern.permute.xlu1 %v664_v6  ;;  %627 = vset.pattern.permute.xlu0 %v663_v5  ;;  %v728_v51 = vrot.slane %v154_v33, %v145_v20  ;;  %v730_v52 = vrot.slane %v158_v34, %v145_v20  ;;  %v732_v53 = vrot.slane %v230_v36, %v229_v23 }
  0x10   :  { %128 = vperm.xlu1 %625, %v17_v1   ;;  %96 = vperm.xlu0 %627, %v17_v1   ;;  %v734_v59 = vrot.slane %v234_v42, %v229_v23  ;;  %v736_v60 = vrot.slane %v238_v43, %v229_v23  ;;  %v738_v61 = vrot.slane %v242_v44, %v229_v23 }
  0x11   :  { %v740_v62 = vrot.slane %v314_v45, %v313_v29  ;;  %v746_v2 = vrot.slane %v326_v49, %v313_v29 }
  0x14   :  { %628 = vset.pattern.permute.xlu1 %v663_v5  ;;  %108 = vperm.xlu0 %627, %v20_v3  }
  0x15   :  { %104 = vperm.xlu1 %628, %v19_v0  }
  0x18   :  { %631 = vset.pattern.permute.xlu0 %v665_v7 }
  0x19   :  { %629 = vset.pattern.permute.xlu1 %v664_v6  ;;  %216 = vperm.xlu0 %631, %v18_v4  }
  0x1a   :  { %136 = vperm.xlu1 %629, %v19_v0  }
  0x1d   :  { %632 = vset.pattern.permute.xlu0 %v666_v8 }
  0x1e   :  { %140 = vperm.xlu1 %629, %v20_v3   ;;  %296 = vperm.xlu0 %632, %v17_v1  }
  0x22   :  { %630 = vset.pattern.permute.xlu1 %v665_v7  ;;  %308 = vperm.xlu0 %632, %v20_v3  }
  0x23   :  { %212 = vperm.xlu1 %630, %v17_v1   ;;  %v744_v1 = vrot.slane %v322_v48, %v313_v29 }
  0x27   :  { %220 = vperm.xlu1 %630, %v19_v0  }
  0x2b   :  { %224 = vperm.xlu1 %630, %v20_v3  }
  0x2f   :  { %633 = vset.pattern.permute.xlu1 %v666_v8 }
  0x30   :  { %300 = vperm.xlu1 %633, %v18_v4  }
  0x34   :  { %304 = vperm.xlu1 %633, %v19_v0   ;;  %v742_v0 = vrot.slane %v318_v47, %v313_v29 }
  0x81   :  { %v703_v10 = vpop.permute.xlu1 %33  ;;  %v24_v11 = vpop.permute.xlu0 %23 }
  0x82   :  { %v79_v63 = vmul.f32 %v66_v37, %v24_v11  ;;  %v83_v3 = vmul.f32 %v66_v37, %v703_v10  ;;  %v80_v4 = vmul.f32 %v70_v38, %v24_v11  ;;  %v87_v5 = vmul.f32 %v74_v39, %v24_v11 }
  0x83   :  { %v88_v6 = vmul.f32 %v78_v40, %v24_v11  ;;  %v84_v30 = vmul.f32 %v70_v38, %v703_v10  ;;  %v91_v31 = vmul.f32 %v74_v39, %v703_v10  ;;  %v92_v32 = vmul.f32 %v78_v40, %v703_v10 }
  0x85   :  { %v708_v13 = vpop.permute.xlu1 %38  ;;  %v29_v14 = vpop.permute.xlu0 %28 }
  0x86   :  { %v81_v54 = vmul.f32 %v66_v37, %v29_v14  ;;  %v82_v55 = vmul.f32 %v70_v38, %v29_v14  ;;  %v89_v56 = vmul.f32 %v74_v39, %v29_v14  ;;  %v90_v57 = vmul.f32 %v78_v40, %v29_v14 }
  0x87   :  { %v86_v33 = vmul.f32 %v70_v38, %v708_v13  ;;  %v93_v34 = vmul.f32 %v74_v39, %v708_v13  ;;  %v94_v36 = vmul.f32 %v78_v40, %v708_v13 }
  0x8a   :  { %v101_v19 = vpop.permute.xlu1 %100  ;;  %v133_v22 = vpop.permute.xlu0 %132 }
  0x8b   :  { %v113_v8 = vadd.f32 %v101_v19, %v81_v54  ;;  %v114_v14 = vadd.f32 %v101_v19, %v82_v55  ;;  %v121_v15 = vadd.f32 %v101_v19, %v89_v56  ;;  %v122_v16 = vadd.f32 %v101_v19, %v90_v57 }
  0x8c   :  { %v181_v17 = vmul.f32 %v724_v46, %v133_v22  ;;  %v182_v18 = vmul.f32 %v726_v50, %v133_v22  ;;  %v189_v20 = vmul.f32 %v728_v51, %v133_v22  ;;  %v190_v21 = vmul.f32 %v730_v52, %v133_v22 }
  0x8d   :  { %v85_v22 = vmul.f32 %v66_v37, %v708_v13 }
  0x8e   :  { %v197_v42 = vadd.f32 %v181_v17, %v113_v8  ;;  %v198_v44 = vadd.f32 %v182_v18, %v114_v14  ;;  %v205_v45 = vadd.f32 %v189_v20, %v121_v15 }
  0x8f   :  { %v129_v35 = vpop.permute.xlu1 %128  ;;  %v97_v41 = vpop.permute.xlu0 %96 }
  0x90   :  { %v179_v24 = vmul.f32 %v724_v46, %v129_v35  ;;  %v180_v25 = vmul.f32 %v726_v50, %v129_v35  ;;  %v187_v11 = vmul.f32 %v728_v51, %v129_v35  ;;  %v111_v26 = vadd.f32 %v97_v41, %v79_v63 }
  0x91   :  { %v188_v27 = vmul.f32 %v730_v52, %v129_v35  ;;  %v112_v28 = vadd.f32 %v97_v41, %v80_v4  ;;  %v119_v19 = vadd.f32 %v97_v41, %v87_v5  ;;  %v120_v29 = vadd.f32 %v97_v41, %v88_v6 }
  0x92   :  { %v206_v41 = vadd.f32 %v190_v21, %v122_v16  ;;  %v195_v47 = vadd.f32 %v179_v24, %v111_v26 }
  0x93   :  { %v109_v7 = vpop.permute.xlu0 %108  ;;  %v196_v48 = vadd.f32 %v180_v25, %v112_v28  ;;  %v203_v49 = vadd.f32 %v187_v11, %v119_v19  ;;  %v204_v54 = vadd.f32 %v188_v27, %v120_v29 }
  0x94   :  { %v105_v58 = vpop.permute.xlu1 %104  ;;  %v117_v55 = vadd.f32 %v109_v7, %v85_v22  ;;  %v118_v10 = vadd.f32 %v109_v7, %v86_v33  ;;  %v125_v56 = vadd.f32 %v109_v7, %v93_v34  ;;  %v126_v37 = vadd.f32 %v109_v7, %v94_v36 }
  0x95   :  { %v115_v57 = vadd.f32 %v105_v58, %v83_v3  ;;  %v116_v39 = vadd.f32 %v105_v58, %v84_v30  ;;  %v123_v63 = vadd.f32 %v105_v58, %v91_v31  ;;  %v124_v4 = vadd.f32 %v105_v58, %v92_v32 }
  0x98   :  { %v217_v43 = vpop.permute.xlu0 %216 }
  0x99   :  { %v137_v23 = vpop.permute.xlu1 %136  ;;  %v265_v38 = vmul.f32 %v732_v53, %v217_v43  ;;  %v266_v13 = vmul.f32 %v734_v59, %v217_v43  ;;  %v273_v5 = vmul.f32 %v736_v60, %v217_v43  ;;  %v274_v6 = vmul.f32 %v738_v61, %v217_v43 }
  0x9a   :  { %v183_v8 = vmul.f32 %v724_v46, %v137_v23  ;;  %v184_v15 = vmul.f32 %v726_v50, %v137_v23  ;;  %v191_v7 = vmul.f32 %v728_v51, %v137_v23  ;;  %v192_v17 = vmul.f32 %v730_v52, %v137_v23 }
  0x9b   :  { %v281_v20 = vadd.f32 %v265_v38, %v197_v42  ;;  %v282_v11 = vadd.f32 %v266_v13, %v198_v44  ;;  %v289_v19 = vadd.f32 %v273_v5, %v205_v45  ;;  %v290_v29 = vadd.f32 %v274_v6, %v206_v41 }
  0x9c   :  { %v199_v30 = vadd.f32 %v183_v8, %v115_v57  ;;  %v200_v31 = vadd.f32 %v184_v15, %v116_v39  ;;  %v207_v22 = vadd.f32 %v191_v7, %v123_v63  ;;  %v208_v36 = vadd.f32 %v192_v17, %v124_v4 }
  0x9d   :  { %v141_v35 = vpop.permute.xlu1 %140  ;;  %v297_v40 = vpop.permute.xlu0 %296 }
  0x9e   :  { %v347_v18 = vmul.f32 %v740_v62, %v297_v40  ;;  %v348_v58 = vmul.f32 %v742_v0, %v297_v40  ;;  %v185_v21 = vmul.f32 %v724_v46, %v141_v35  ;;  %v186_v23 = vmul.f32 %v726_v50, %v141_v35 }
  0x9f   :  { %v193_v32 = vmul.f32 %v728_v51, %v141_v35  ;;  %v194_v33 = vmul.f32 %v730_v52, %v141_v35  ;;  %v355_v43 = vmul.f32 %v744_v1, %v297_v40  ;;  %v356_v44 = vmul.f32 %v746_v2, %v297_v40 }
  0xa0   :  { %v201_v42 = vadd.f32 %v185_v21, %v117_v55  ;;  %v202_v50 = vadd.f32 %v186_v23, %v118_v10 }
  0xa1   :  { %v209_v39 = vadd.f32 %v193_v32, %v125_v56  ;;  %v210_v35 = vadd.f32 %v194_v33, %v126_v37 }
  0xa2   :  { %v213_v14 = vpop.permute.xlu1 %212 }
  0xa3   :  { %v263_v16 = vmul.f32 %v732_v53, %v213_v14  ;;  %v264_v3 = vmul.f32 %v734_v59, %v213_v14  ;;  %v271_v26 = vmul.f32 %v736_v60, %v213_v14  ;;  %v272_v27 = vmul.f32 %v738_v61, %v213_v14 }
  0xa5   :  { %v279_v24 = vadd.f32 %v263_v16, %v195_v47  ;;  %v280_v25 = vadd.f32 %v264_v3, %v196_v48  ;;  %v309_v47 = vpop.permute.xlu0 %308  ;;  %v287_v38 = vadd.f32 %v271_v26, %v203_v49  ;;  %v288_v57 = vadd.f32 %v272_v27, %v204_v54 }
  0xa6   :  { %v221_v28 = vpop.permute.xlu1 %220  ;;  %v353_v63 = vmul.f32 %v740_v62, %v309_v47  ;;  %v354_v55 = vmul.f32 %v742_v0, %v309_v47  ;;  %v361_v54 = vmul.f32 %v744_v1, %v309_v47  ;;  %v362_v10 = vmul.f32 %v746_v2, %v309_v47 }
  0xa7   :  { %v363_v46 = vadd.f32 %v347_v18, %v279_v24  ;;  %v364_v34 = vadd.f32 %v348_v58, %v280_v25  ;;  %v275_v51 = vmul.f32 %v736_v60, %v221_v28  ;;  %v276_v52 = vmul.f32 %v738_v61, %v221_v28 }
  0xa8   :  { %v267_v40 = vmul.f32 %v732_v53, %v221_v28  ;;  %v268_v4 = vmul.f32 %v734_v59, %v221_v28  ;;  %v371_v56 = vadd.f32 %v355_v43, %v287_v38  ;;  %v372_v37 = vadd.f32 %v356_v44, %v288_v57 }
  0xa9   :  { %v379_v41 = vmax.f32 %v363_v46, 0.0  ;;  %v380_v48 = vmax.f32 %v364_v34, 0.0  ;;  %v291_v15 = vadd.f32 %v275_v51, %v207_v22  ;;  %v292_v7 = vadd.f32 %v276_v52, %v208_v36 }
  0xaa   :  { %v225_v45 = vpop.permute.xlu1 %224  ;;  %v283_v17 = vadd.f32 %v267_v40, %v199_v30  ;;  %v284_v18 = vadd.f32 %v268_v4, %v200_v31  ;;  %v387_v27 = vmax.f32 %v371_v56, 0.0  ;;  %v388_v28 = vmax.f32 %v372_v37, 0.0  ;;  %v428_v4 = vld [vmem:[%s838_s2] sm:$0xff] }
  0xab   :  { %v395_v13 = vadd.f32 %v380_v48, %v379_v41  ;;  %v277_v5 = vmul.f32 %v736_v60, %v225_v45  ;;  %v278_v49 = vmul.f32 %v738_v61, %v225_v45  ;;  %v269_v6 = vmul.f32 %v732_v53, %v225_v45 }
  0xac   :  { %v270_v8 = vmul.f32 %v734_v59, %v225_v45  ;;  %v669_v56 = vmov 0.0  }
  0xad   :  { %396 = vadd.xlane.f32.xlu1 %v395_v13  ;;  %v293_v58 = vadd.f32 %v277_v5, %v209_v39  ;;  %v294_v21 = vadd.f32 %v278_v49, %v210_v35  ;;  %v285_v23 = vadd.f32 %v269_v6, %v201_v42  ;;  %v667_v5 = vmov 0.0|0.0   ;;  %v430_v49 = vld [vmem:[%s838_s2 + $0x10] sm:$0xff]  ;;  %604 = vmatprep.mubr.msk.f32.mxu0 %vm668_vm0, %v669_v56 }
  0xae   :  { %v286_v32 = vadd.f32 %v270_v8, %v202_v50  ;;  %607 = vmatprep.subr.bf16.mxu0 %v667_v5 }
  0xaf   :  { %v301_v14 = vpop.permute.xlu1 %300  ;;  %v378_v43 = vadd.f32 %v362_v10, %v294_v21  ;;  %v369_v48 = vadd.f32 %v353_v63, %v285_v23  ;;  %v429_v63 = vld [vmem:[%s838_s2 + $0x8] sm:$0xff] }
  0xb0   :  { %v349_v16 = vmul.f32 %v740_v62, %v301_v14  ;;  %v350_v60 = vmul.f32 %v742_v0, %v301_v14  ;;  %v357_v61 = vmul.f32 %v744_v1, %v301_v14  ;;  %v358_v3 = vmul.f32 %v746_v2, %v301_v14 }
  0xb1   :  { %v394_v39 = vmax.f32 %v378_v43, 0.0  ;;  %v385_v35 = vmax.f32 %v369_v48, 0.0  ;;  %v446_v14 = vand.u32 127, %v43_v9 }
  0xb2   :  { %v365_v24 = vadd.f32 %v349_v16, %v281_v20  ;;  %v366_v25 = vadd.f32 %v350_v60, %v282_v11  ;;  %v373_v53 = vadd.f32 %v357_v61, %v289_v19  ;;  %v374_v26 = vadd.f32 %v358_v3, %v290_v29 }
  0xb3   :  { %v305_v59 = vpop.permute.xlu1 %304  ;;  %v377_v29 = vadd.f32 %v361_v54, %v293_v58  ;;  %v431_v54 = vld [vmem:[%s838_s2 + $0x18] sm:$0xff]  ;;  %v458_v16 = vadd.s32 4294967280, %v446_v14  ;;  %v465_v61 = vadd.s32 4294967272, %v446_v14 }
  0xb4   :  { %v351_v22 = vmul.f32 %v740_v62, %v305_v59  ;;  %v352_v33 = vmul.f32 %v742_v0, %v305_v59  ;;  %v359_v46 = vmul.f32 %v744_v1, %v305_v59  ;;  %v360_v30 = vmul.f32 %v746_v2, %v305_v59 }
  0xb5   :  { %v381_v31 = vmax.f32 %v365_v24, 0.0  ;;  %v382_v34 = vmax.f32 %v366_v25, 0.0  ;;  %v389_v36 = vmax.f32 %v373_v53, 0.0  ;;  %v390_v20 = vmax.f32 %v374_v26, 0.0 }
  0xb6   :  { %v375_v11 = vadd.f32 %v359_v46, %v291_v15  ;;  %v376_v19 = vadd.f32 %v360_v30, %v292_v7  ;;  %v367_v42 = vadd.f32 %v351_v22, %v283_v17  ;;  %v368_v45 = vadd.f32 %v352_v33, %v284_v18 }
  0xb7   :  { %v398_v44 = vadd.f32 %v382_v34, %v381_v31  ;;  %v410_v47 = vadd.f32 %v390_v20, %v389_v36  ;;  %v407_v0 = vadd.f32 %v388_v28, %v387_v27  ;;  %v370_v2 = vadd.f32 %v354_v55, %v286_v32 }
  0xb8   :  { %v391_v41 = vmax.f32 %v375_v11, 0.0  ;;  %v392_v62 = vmax.f32 %v376_v19, 0.0  ;;  %v383_v38 = vmax.f32 %v367_v42, 0.0  ;;  %v384_v57 = vmax.f32 %v368_v45, 0.0  ;;  %v588_v42 = vld [vmem:[%s838_s2 + $0x20] ss:$0 sm:$0xff] }
  0xb9   :  { %399 = vadd.xlane.f32.xlu0 %v398_v44  ;;  %411 = vadd.xlane.f32.xlu1 %v410_v47  ;;  %v393_v50 = vmax.f32 %v377_v29, 0.0  ;;  %v386_v13 = vmax.f32 %v370_v2, 0.0  ;;  %v608_v55 = vpack.c.bf16 %v429_v63, %v428_v4  ;;  %v611_v10 = vpack.c.bf16 %v431_v54, %v430_v49 }
  0xba   :  { %v413_v1 = vadd.f32 %v392_v62, %v391_v41  ;;  %v401_v51 = vadd.f32 %v384_v57, %v383_v38  ;;  %v451_v15 = vadd.s32 4294967288, %v446_v14  ;;  %v449_v17 = vsub.s32 %v446_v14, %v706_v12 }
  0xbb   :  { %v416_v52 = vadd.f32 %v394_v39, %v393_v50  ;;  %v404_v40 = vadd.f32 %v386_v13, %v385_v35  ;;  %609 = vmatpush3.bf16.msra.mxu0 %v608_v55  ;;  %v461_v24 = vsub.s32 %v458_v16, %v706_v12  ;;  %v468_v26 = vsub.s32 %v465_v61, %v706_v12 }
  0xbc   :  { %610 = vmatprep.subr.bf16.mxu0 %v667_v5  ;;  %v454_v18 = vsub.s32 %v451_v15, %v706_v12 }
  0xbd   :  { %408 = vadd.xlane.f32.xlu0 %v407_v0  ;;  %414 = vadd.xlane.f32.xlu1 %v413_v1 }
  0xbf   :  { %612 = vmatpush3.bf16.msra.mxu0 %v611_v10 }
  0xc1   :  { %402 = vadd.xlane.f32.xlu0 %v401_v51  ;;  %417 = vadd.xlane.f32.xlu1 %v416_v52 }
  0xc5   :  { %405 = vadd.xlane.f32.xlu0 %v404_v40 }
 0x13a   :  { %v397_v37 = vpop.xlane.xlu1 %396 }
 0x13b   :  { %v420_v9 = vmul.f32 0.00390625, %v397_v37 }
 0x13d   :  { %v450_v31 = vrot.slane %v420_v9, %v449_v17 }
 0x146   :  { %v400_v6 = vpop.xlane.xlu0 %399  ;;  %v412_v8 = vpop.xlane.xlu1 %411 }
 0x147   :  { %v421_v58 = vmul.f32 0.00390625, %v400_v6  ;;  %v425_v21 = vmul.f32 0.00390625, %v412_v8 }
 0x149   :  { %v455_v32 = vrot.slane %v421_v58, %v454_v18  ;;  %v479_v22 = vrot.slane %v425_v21, %v454_v18 }
 0x14a   :  { %v409_v7 = vpop.xlane.xlu0 %408  ;;  %v415_v60 = vpop.xlane.xlu1 %414 }
 0x14b   :  { %v424_v3 = vmul.f32 0.00390625, %v409_v7  ;;  %v426_v25 = vmul.f32 0.00390625, %v415_v60  ;;  %v457_v11 = vsel %vm456_vm1, %v455_v32, %v450_v31 }
 0x14d   :  { %v475_v27 = vrot.slane %v424_v3, %v449_v17  ;;  %v484_v33 = vrot.slane %v426_v25, %v461_v24 }
 0x14e   :  { %v403_v53 = vpop.xlane.xlu0 %402  ;;  %v418_v59 = vpop.xlane.xlu1 %417 }
 0x14f   :  { %v422_v28 = vmul.f32 0.00390625, %v403_v53  ;;  %v427_v23 = vmul.f32 0.00390625, %v418_v59  ;;  %v480_v34 = vsel %vm456_vm1, %v479_v22, %v475_v27 }
 0x150   :  { %v485_v12 = vsel %vm463_vm2, %v484_v33, %v480_v34 }
 0x151   :  { %v462_v46 = vrot.slane %v422_v28, %v461_v24  ;;  %v489_v36 = vrot.slane %v427_v23, %v468_v26 }
 0x152   :  { %v406_v30 = vpop.xlane.xlu0 %405 }
 0x153   :  { %v423_v20 = vmul.f32 0.00390625, %v406_v30  ;;  %v464_v29 = vsel %vm463_vm2, %v462_v46, %v457_v11  ;;  %v490_v44 = vsel %vm470_vm3, %v489_v36, %v485_v12 }
 0x155   :  { %v469_v19 = vrot.slane %v423_v20, %v468_v26 }
 0x157   :  { %v471_v43 = vsel %vm470_vm3, %v469_v19, %v464_v29 }
 0x158   :  { %v492_v47 = vsel %vm491_vm4, %v490_v44, %v471_v43 }
 0x159   :  { %605 = vmatmul.mubr.msk.f32.vlgmr.msra.gmra.mrb[0].mxu0 %vm493_vm5, %v492_v47 }
 0x22c   :  { %v562_v45 = vpop.f32.mrb[0].mxu0 }
 0x22d   :  { %v563_v41 = vadd.f32 %v588_v42, %v562_v45  ;;  %v606_v62 = vpop.f32.mrb[1].mxu0 }
 0x22f   :  { %v590_v0 = vmul.f32 -1.442695, %v563_v41 }
 0x231   :  { %634 = vpow2.f32 %v590_v0 }
 0x23b   :  { %v635_v1 = vpop.eup %634 }
 0x23c   :  { %v569_v48 = vadd.f32 1.0, %v635_v1 }
 0x23e   :  { %636 = vrcp.f32 %v569_v48 }
 0x248   :  { %v637_v2 = vpop.eup %636 }
 0x249   :  { %573 = vst.msk [vmem:[#allocation2] sm:$0x3] %vm572_vm6, %v637_v2 }
 0x24a   :  { %649 = shalt.err (!%p646_p4)
}
 0x24b   :  { %s650_s9 = scalar_lea.hbm %s839_s3, 32 }
 0x24c   :  { %p651_p5 = scmp.ne.s32.totalorder %s839_s3, %s650_s9  ;;  %p654_p6 = scmp.lt.u32.totalorder %s650_s9, %s839_s3 }
 0x24e   :  { %p656_p7 = pnand %p654_p6, %p651_p5 }
 0x250   :  { %659 = shalt.err (!%p656_p7)
}
 0x251   :  { %583 = dma.vmem_to_hbm [thread:$0]  %s581_s6, 32, %s839_s3, [#allocation3]  }
 0x252   :  { %660 = dma.done.wait [#allocation3], 32  }
 0x253   :  { %661 = vsyncadd [#allocation3], 4294967264 }
 0x254   :  { %587 = vsyncpa [#allocation3], 1 }

</bundles_post_ra>
